<compile_context>
chip_gen: v7x
topology: tpu7x:2x2x1
jax: 0.10.0
libtpu: 0.0.40
codegen_flags: <defaults>
</compile_context>

<pallas_src>
import jax
import jax.numpy as jnp
from jax.experimental import pallas as pl
from jax.experimental.pallas import tpu as pltpu


# Sobel taps, deterministic in-script init (same values as the PyTorch module).
# kernelx = [[-1, 0, 1], [-2, 0, 2], [-1, 0, 1]]
# kernely = [[ 1, 2, 1], [ 0, 0, 0], [-1, -2, -1]]
_KX = ((-1.0, 0.0, 1.0), (-2.0, 0.0, 2.0), (-1.0, 0.0, 1.0))
_KY = ((1.0, 2.0, 1.0), (0.0, 0.0, 0.0), (-1.0, -2.0, -1.0))


# ---------------------------------------------------------------------------
# Kernel bodies
# ---------------------------------------------------------------------------

def _sobel_tile(x, top_row, bot_row):
    """Sobel |gx|+|gy| on one (TB, TH, W) tile given its (TB, 1, W) neighbour rows.

    Separable form: vertical pass s = x[i-1]+2x[i]+x[i+1], d = x[i-1]-x[i+1];
    horizontal pass gx = s[j+1]-s[j-1], gy = d[j-1]+2d[j]+d[j+1].
    top_row/bot_row are the rows just above/below the tile (already zeroed at the
    true image border), so all work happens on register values — no VMEM scratch.
    """
    TB, TH, W = x.shape

    # ---- H (sublane) direction: neighbour rows via halo + in-register slices ----
    if TH > 1:
        x_up = jnp.concatenate([top_row, x[:, :TH - 1, :]], axis=1)   # x[i-1, j]
        x_dn = jnp.concatenate([x[:, 1:, :], bot_row], axis=1)        # x[i+1, j]
    else:
        x_up, x_dn = top_row, bot_row

    s = x_up + 2.0 * x + x_dn          # vertical smoothing  -> used for gx
    d = x_up - x_dn                    # vertical difference -> used for gy

    # ---- W (lane) direction ----
    if W % 128 == 0:
        # Lane-aligned: XLU lane rotations + iota border masks (no misaligned stores).
        col = jax.lax.broadcasted_iota(jnp.int32, (TB, TH, W), 2)
        s_l = jnp.where(col == 0, 0.0, pltpu.roll(s, shift=1, axis=2))          # s[i, j-1]
        d_l = jnp.where(col == 0, 0.0, pltpu.roll(d, shift=1, axis=2))
        s_r = jnp.where(col == W - 1, 0.0, pltpu.roll(s, shift=W - 1, axis=2))  # s[i, j+1]
        d_r = jnp.where(col == W - 1, 0.0, pltpu.roll(d, shift=W - 1, axis=2))
    else:
        # Small / unaligned W: zero-column concatenation (always lowers; the shifts
        # still happen on register values, never through a VMEM scratch).
        z = jnp.zeros((TB, TH, 1), jnp.float32)
        s_l = jnp.concatenate([z, s[:, :, :W - 1]], axis=2)
        d_l = jnp.concatenate([z, d[:, :, :W - 1]], axis=2)
        s_r = jnp.concatenate([s[:, :, 1:], z], axis=2)
        d_r = jnp.concatenate([d[:, :, 1:], z], axis=2)

    gx = s_r - s_l
    gy = d_l + 2.0 * d + d_r
    return jnp.abs(gx) + jnp.abs(gy)


def _sobel_kernel_single(x_ref, o_ref):
    """Whole-image-per-block variant (no H tiling): image borders are plain zeros."""
    TB, TH, W = o_ref.shape
    z = jnp.zeros((TB, 1, W), jnp.float32)
    o_ref[...] = _sobel_tile(x_ref[...], z, z)


def _sobel_kernel_tiled(x_ref, top_ref, bot_ref, o_ref):
    """H-tiled variant: top_ref/bot_ref are 8-row halo blocks around the current tile."""
    h = pl.program_id(1)
    nh = pl.num_programs(1)
    halo = top_ref.shape[1]
    # Row just above / below this tile; zero at the true image top / bottom.
    top_row = jnp.where(h == 0, 0.0, top_ref[:, halo - 1:halo, :])
    bot_row = jnp.where(h == nh - 1, 0.0, bot_ref[:, 0:1, :])
    o_ref[...] = _sobel_tile(x_ref[...], top_row, bot_row)


# ---------------------------------------------------------------------------
# Tiling / VMEM sizing helpers (generation-aware)
# ---------------------------------------------------------------------------

def _physical_vmem_bytes():
    try:
        info = pltpu.get_tpu_info()
        v = getattr(info, "vmem_capacity_bytes", None)
        if v:
            return int(v)
    except Exception:
        pass
    return 64 << 20  # conservative default: v7x per-TensorCore VMEM


def _footprint_bytes(tb, th, w, halo, with_halo):
    """Per-grid-step VMEM footprint: f32, double-buffered in + out (+ two halo blocks)."""
    blocks = 2 * tb * th * w                 # main input + output block
    if with_halo:
        blocks += 2 * tb * halo * w          # top + bottom 8-row halo blocks
    return 4 * 2 * blocks                    # f32 bytes x double buffering


def _choose_tiles(N, H, W, halo, cap_bytes, target_block_bytes):
    """Pick (batch_tile TB, row_tile TH) under the per-step VMEM cap."""
    # 1) TH: full image if a TB=1 block fits; else the largest 8-multiple divisor of H
    #    that fits (needed e.g. for 2048x2048 f32 images on v7x's 64 MiB VMEM).
    TH = H
    if _footprint_bytes(1, H, W, halo, with_halo=False) > cap_bytes:
        t, best = 8, None
        while t < H:
            if H % t == 0 and _footprint_bytes(1, t, W, halo, with_halo=True) <= cap_bytes:
                best = t
            t += 8
        if best is not None:
            TH = best
    nh = H // TH

    # 2) TB: aim for ~target_block_bytes of input per step, within the cap.
    per_img = TH * W * 4
    TB = max(1, min(N, target_block_bytes // max(per_img, 1)))
    while TB > 1 and _footprint_bytes(TB, TH, W, halo, nh > 1) > cap_bytes:
        TB -= 1

    # 3) Keep at least min(4, N*nh) grid steps so the DMA pipeline overlaps and both
    #    v7x TensorCores get work (megacore shards the "parallel" grid axes).
    want = min(4, N * nh)
    while TB > 1 and (-(-N // TB)) * nh < want:
        TB -= 1
    return TB, TH


# ---------------------------------------------------------------------------
# Public wrapper
# ---------------------------------------------------------------------------

def sobelxy(x, *, batch_tile=None, tile_h=None):
    """x: (N, 1, H, W) float32 -> (N, 1, H, W) float32
       = |conv2d(x, Kx, padding=1)| + |conv2d(x, Ky, padding=1)| (PyTorch Sobelxy)."""
    x = jnp.asarray(x, dtype=jnp.float32)
    N, C, H, W = x.shape
    assert C == 1, "Sobelxy uses a (1,1,3,3) conv weight -> single input channel"
    assert H >= 2 and W >= 2, "degenerate 1-pixel-wide images are not supported"

    xs = x.reshape(N, H, W)                  # drop the unit channel dim (index plumbing)
    halo = 8 if H >= 8 else H                # halo block rows (sublane-aligned)

    phys = _physical_vmem_bytes()
    cap = min(phys // 3, 48 << 20)           # per-step cap: ~21 MiB v7x, ~42 MiB v5e/v6e

    tb_auto, th_auto = _choose_tiles(N, H, W, halo, cap, target_block_bytes=6 << 20)
    TH = int(tile_h) if tile_h is not None else th_auto
    TB = int(batch_tile) if batch_tile is not None else tb_auto
    assert H % TH == 0 and (TH == H or TH % 8 == 0), "tile_h must divide H and be a multiple of 8"
    nh = H // TH

    # Pad N up to a multiple of TB (cheaper than collapsing TB for awkward N); slice later.
    nb = -(-N // TB)
    Npad = nb * TB
    if Npad != N:
        xs = jnp.concatenate([xs, jnp.zeros((Npad - N, H, W), jnp.float32)], axis=0)

    # Explicit, generation-aware VMEM limit (v5e defaults to 16 MiB; v7x has only 64 MiB).
    fp = _footprint_bytes(TB, TH, W, halo, with_halo=(nh > 1))
    vmem_limit = int(min(max(fp + (4 << 20), 16 << 20), phys - (16 << 20)))

    if nh == 1:
        grid = (nb,)
        in_specs = [pl.BlockSpec((TB, H, W), lambda b: (b, 0, 0))]
        out_specs = pl.BlockSpec((TB, H, W), lambda b: (b, 0, 0))
        kernel = _sobel_kernel_single
        args = (xs,)
        dims = ("parallel",)
    else:
        r = TH // halo                        # halo blocks per row tile (TH % 8 == 0 here)
        nbh = -(-H // halo)                   # number of halo blocks along H
        grid = (nb, nh)
        in_specs = [
            pl.BlockSpec((TB, TH, W), lambda b, h: (b, h, 0)),
            # 8-row block whose LAST row is the row just above the tile (clamped at h==0).
            pl.BlockSpec((TB, halo, W), lambda b, h: (b, jnp.maximum(h * r - 1, 0), 0)),
            # 8-row block whose FIRST row is the row just below the tile (clamped at last h).
            pl.BlockSpec((TB, halo, W), lambda b, h: (b, jnp.minimum((h + 1) * r, nbh - 1), 0)),
        ]
        out_specs = pl.BlockSpec((TB, TH, W), lambda b, h: (b, h, 0))
        kernel = _sobel_kernel_tiled
        args = (xs, xs, xs)                   # same HBM buffer, three read-only views
        dims = ("parallel", "parallel")

    out = pl.pallas_call(
        kernel,
        out_shape=jax.ShapeDtypeStruct((Npad, H, W), jnp.float32),
        grid_spec=pltpu.PrefetchScalarGridSpec(
            num_scalar_prefetch=0,
            grid=grid,
            in_specs=in_specs,
            out_specs=out_specs,
        ),
        compiler_params=pltpu.CompilerParams(
            dimension_semantics=dims,
            vmem_limit_bytes=vmem_limit,
        ),
    )(*args)

    return out[:N].reshape(N, 1, H, W)


# ---------------------------------------------------------------------------
# Pure-JAX reference and self-test
# ---------------------------------------------------------------------------

def _reference(x):
    """F.conv2d(x, Kx, padding=1), F.conv2d(x, Ky, padding=1), |.| + |.|."""
    kx = jnp.asarray(_KX, dtype=jnp.float32).reshape(1, 1, 3, 3)
    ky = jnp.asarray(_KY, dtype=jnp.float32).reshape(1, 1, 3, 3)
    dn = jax.lax.conv_dimension_numbers(x.shape, kx.shape, ("NCHW", "OIHW", "NCHW"))
    cx = jax.lax.conv_general_dilated(x, kx, (1, 1), ((1, 1), (1, 1)), dimension_numbers=dn)
    cy = jax.lax.conv_general_dilated(x, ky, (1, 1), ((1, 1), (1, 1)), dimension_numbers=dn)
    return jnp.abs(cx) + jnp.abs(cy)


if __name__ == "__main__":
    key = jax.random.PRNGKey(0)
    # Small shape consistent with the module: the conv weight is (1,1,3,3) -> 1 channel.
    x = jax.random.normal(key, (2, 1, 16, 16), dtype=jnp.float32)
    out = jax.block_until_ready(sobelxy(x))
    ref = jax.block_until_ready(_reference(x))
    assert out.shape == ref.shape == (2, 1, 16, 16)
    assert jnp.allclose(out, ref, atol=1e-4, rtol=1e-4), "mismatch (small-W concat path)"

    # Validate the lane-aligned pltpu.roll path (W multiple of 128).
    x2 = jax.random.normal(jax.random.PRNGKey(1), (2, 1, 16, 128), dtype=jnp.float32)
    out2 = jax.block_until_ready(sobelxy(x2))
    assert jnp.allclose(out2, _reference(x2), atol=1e-4, rtol=1e-4), "mismatch (roll path)"

    # Validate the H-tiled halo path + batch padding (forced tiles on a tiny image).
    x3 = jax.random.normal(jax.random.PRNGKey(2), (3, 1, 64, 128), dtype=jnp.float32)
    out3 = jax.block_until_ready(sobelxy(x3, batch_tile=2, tile_h=32))
    assert jnp.allclose(out3, _reference(x3), atol=1e-4, rtol=1e-4), "mismatch (H-tiled halo path)"

    print("KERNEL_OK")
</pallas_src>

<mosaic_0001>
module attributes {stable_mosaic.version = 11 : i64} {
  func.func @_sobel_kernel_single(%arg0: i32, %arg1: memref<1x16x16xf32, #tpu.memory_space<vmem>>, %arg2: memref<1x16x16xf32, #tpu.memory_space<vmem>>) attributes {dimension_semantics = [#tpu.dimension_semantics<parallel>], iteration_bounds = array<i64: 2>, scalar_prefetch = 0 : i64, scratch_operands = 0 : i64, tpu.core_type = #tpu.core_type<tc>, window_params = [{transform_indices = @transform_0, window_bounds = array<i64: 1, 16, 16>}, {transform_indices = @transform_1, window_bounds = array<i64: 1, 16, 16>}]} {
    %cst = arith.constant 0.000000e+00 : f32
    %0 = vector.broadcast %cst : f32 to vector<1x1x16xf32>
    %c0 = arith.constant 0 : index
    %c0_0 = arith.constant 0 : index
    %c0_1 = arith.constant 0 : index
    %1 = vector.load %arg1[%c0, %c0_0, %c0_1] : memref<1x16x16xf32, #tpu.memory_space<vmem>>, vector<1x16x16xf32>
    %2 = vector.extract_strided_slice %1 {offsets = [0, 0, 0], sizes = [1, 15, 16], strides = [1, 1, 1]} : vector<1x16x16xf32> to vector<1x15x16xf32>
    %3 = tpu.concatenate %0, %2 in 1 : vector<1x1x16xf32>, vector<1x15x16xf32> -> vector<1x16x16xf32>
    %4 = vector.extract_strided_slice %1 {offsets = [0, 1, 0], sizes = [1, 15, 16], strides = [1, 1, 1]} : vector<1x16x16xf32> to vector<1x15x16xf32>
    %5 = tpu.concatenate %4, %0 in 1 : vector<1x15x16xf32>, vector<1x1x16xf32> -> vector<1x16x16xf32>
    %cst_2 = arith.constant 2.000000e+00 : f32
    %6 = vector.broadcast %cst_2 : f32 to vector<1x16x16xf32>
    %7 = arith.mulf %6, %1 : vector<1x16x16xf32>
    %8 = arith.addf %3, %7 : vector<1x16x16xf32>
    %9 = arith.addf %8, %5 : vector<1x16x16xf32>
    %10 = arith.subf %3, %5 : vector<1x16x16xf32>
    %cst_3 = arith.constant 0.000000e+00 : f32
    %11 = vector.broadcast %cst_3 : f32 to vector<1x16x1xf32>
    %12 = vector.extract_strided_slice %9 {offsets = [0, 0, 0], sizes = [1, 16, 15], strides = [1, 1, 1]} : vector<1x16x16xf32> to vector<1x16x15xf32>
    %13 = tpu.concatenate %11, %12 in 2 : vector<1x16x1xf32>, vector<1x16x15xf32> -> vector<1x16x16xf32>
    %14 = vector.extract_strided_slice %10 {offsets = [0, 0, 0], sizes = [1, 16, 15], strides = [1, 1, 1]} : vector<1x16x16xf32> to vector<1x16x15xf32>
    %15 = tpu.concatenate %11, %14 in 2 : vector<1x16x1xf32>, vector<1x16x15xf32> -> vector<1x16x16xf32>
    %16 = vector.extract_strided_slice %9 {offsets = [0, 0, 1], sizes = [1, 16, 15], strides = [1, 1, 1]} : vector<1x16x16xf32> to vector<1x16x15xf32>
    %17 = tpu.concatenate %16, %11 in 2 : vector<1x16x15xf32>, vector<1x16x1xf32> -> vector<1x16x16xf32>
    %18 = vector.extract_strided_slice %10 {offsets = [0, 0, 1], sizes = [1, 16, 15], strides = [1, 1, 1]} : vector<1x16x16xf32> to vector<1x16x15xf32>
    %19 = tpu.concatenate %18, %11 in 2 : vector<1x16x15xf32>, vector<1x16x1xf32> -> vector<1x16x16xf32>
    %20 = arith.subf %17, %13 : vector<1x16x16xf32>
    %cst_4 = arith.constant 2.000000e+00 : f32
    %21 = vector.broadcast %cst_4 : f32 to vector<1x16x16xf32>
    %22 = arith.mulf %21, %10 : vector<1x16x16xf32>
    %23 = arith.addf %15, %22 : vector<1x16x16xf32>
    %24 = arith.addf %23, %19 : vector<1x16x16xf32>
    %25 = math.absf %20 : vector<1x16x16xf32>
    %26 = math.absf %24 : vector<1x16x16xf32>
    %27 = arith.addf %25, %26 : vector<1x16x16xf32>
    %c0_5 = arith.constant 0 : index
    %c0_6 = arith.constant 0 : index
    %c0_7 = arith.constant 0 : index
    %28 = vector.load %arg2[%c0_5, %c0_6, %c0_7] : memref<1x16x16xf32, #tpu.memory_space<vmem>>, vector<1x16x16xf32>
    tpu.vector_store %arg2[%c0_5, %c0_6, %c0_7], %27 {strides = array<i32>} : memref<1x16x16xf32, #tpu.memory_space<vmem>>, vector<1x16x16xf32>,
    return
  }
  func.func @transform_0(%arg0: i32) -> (i32, i32, i32) {
    %c0_i32 = arith.constant 0 : i32
    %c0_i32_0 = arith.constant 0 : i32
    %c0_i32_1 = arith.constant 0 : i32
    return %arg0, %c0_i32, %c0_i32_0 : i32, i32, i32
  }
  func.func @transform_1(%arg0: i32) -> (i32, i32, i32) {
    %c0_i32 = arith.constant 0 : i32
    %c0_i32_0 = arith.constant 0 : i32
    %c0_i32_1 = arith.constant 0 : i32
    return %arg0, %c0_i32, %c0_i32_0 : i32, i32, i32
  }
}

</mosaic_0001>

<bundles_post_ra>
// kernel: tpu_custom_call.1
= control target key start
LH: loop header
LB: loop body
LE: loop exit
PB: predicated region body
PF: predicated region fallthrough
CT: control target
= control target key end

     0   :  { %6 = vsyncpa [#allocation3], 0  ;;  %s657_s0 = inlined_call_operand.hbm [shape: f32[2,16,16], index: 0, kind: input, shape index: {}]   ;;  %s658_s1 = inlined_call_operand.hbm [shape: f32[2,16,16], index: 1, kind: output, shape index: {}]  }
   0x1   :  { %8 = vsyncpa [#allocation3 + $0x1], 0 }
   0x2   :  { %9 = vsyncpa [#allocation4], 0 }
   0x3   :  { %11 = vsyncpa [#allocation4 + $0x1], 0  ;;  %s487_s6 = smov 0   ;;  %s489_s7 = smov 0  }
   0x4   :  { %s491_s8 = smov 0   ;;  %s493_s9 = smov 0  }
   0x5 LB: > { %s508_s10 = sadd.s32 4294967295, %s467_s9   ;;  %s303_s11 = sadd.s32 4294967294, %s467_s9   ;;  %s467_s9 = sphi %s493_s9, %s671_s9   ;;  %s463_s8 = sphi %s491_s8, %s670_s8   ;;  %s459_s7 = sphi %s489_s7, %s669_s7   ;;  %s455_s6 = sphi %s487_s6, %s668_s6  }
   0x6   : > { %s512_s12 = sadd.s32 1, %s467_s9   ;;  %s24_s13 = sadd.s32 1, %s463_s8 }
   0x7   : > { %s21_s14 = ssub.s32 %s467_s9, %s512_s12  ;;  %p31_p0 = scmp.ne.s32.totalorder %s463_s8, %s459_s7 }
   0x8   : > { %p22_p1 = scmp.eq.s32.totalorder %s21_s14, 0  ;;  %p32_p2 = scmp.eq.s32.totalorder %s467_s9, 0 }
   0x9   : > { %p37_p3 = scmp.ne.s32.totalorder %s459_s7, %s455_s6  ;;  %p38_p4 = scmp.eq.s32.totalorder %s508_s10, 0 }
   0xa   : > { %s524_s15 = scalar_select %p22_p1, %s463_s8, %s24_s13  }
   0xb   : > { %p526_p5 = por %p32_p2, %p31_p0  ;;  %p530_p6 = por %p38_p4, %p37_p3 }
   0xc   : > { %p61_p7 = scmp.eq.s32.totalorder %s508_s10, 1  ;;  %p67_p8 = scmp.eq.s32.totalorder %s303_s11, 1 }
   0xd   : > { %p331_p10 = scmp.lt.s32.totalorder %s467_s9, 2  ;;  %s87_s20 = sand.u32 1, %s463_s8  }
   0xe   : > { %p537_p11 = por %p61_p7, %p31_p0  ;;  %p541_p12 = por %p67_p8, %p37_p3 }
   0xf   : > { %s317_s21 = sshll.u32 %s467_s9, 8  ;;  %s306_s22 = sshll.u32 %s87_s20, 4 }
  0x10   : > { %s662_s18 = scalar_select %p537_p11, 1, 0 }
  0x11   : > { %s663_s19 = scalar_select %p541_p12, 1, 0 }
  0x12   : > { %s550_s25 = scalar_lea.hbm %s657_s0, %s317_s21  ;;  %s91_s26 = scalar_lea.vmem [#allocation2], %s306_s22 }
  0x13   : > { %s98_s27 = sshll.u32 %s91_s26, 4  ;;  %p554_p13 = pnand %p331_p10, %p526_p5  ;;  %s558_s27 = int_to_ptr.vmem [resolvable:$true] %s98_s27 }
  0x14   : > { %s560_s29 = scalar_lea.sflag [#allocation3], %s87_s20  ;;  %s371_s30 = scalar_lea.hbm %s550_s25, 256 }
  0x15   : > { %p372_p0 = scmp.ne.s32.totalorder %s550_s25, %s371_s30  ;;  %p373_p1 = pneg %p554_p13 }
  0x16   : > { %s376_s4 = scalar_lea.hbm %s657_s0, 512  ;;  %p377_p4 = scmp.lt.u32.totalorder %s550_s25, %s657_s0 }
  0x17   : > { %p374_p2 = pnand %p373_p1, %p372_p0  ;;  %p378_p5 = scmp.lt.u32.totalorder %s376_s4, %s371_s30 }
  0x18   : > { %p380_p8 = scmp.lt.u32.totalorder %s371_s30, %s550_s25 }
  0x19   : > { %p375_p3 = pneg %p374_p2  ;;  %p379_p7 = por %p378_p5, %p377_p4 }
  0x1b   : > { %p381_p10 = por %p380_p8, %p379_p7 }
  0x1d   : > { %p382_p9 = pnand %p381_p10, %p375_p3 }
  0x1f   : > { %385 = shalt.err (!%p382_p9)
}
  0x20   : > { %s386_s13 = scalar_lea.vmem %s558_s27, 256  ;;  %s469_s14 = smov [#allocation2]  }
  0x21   : > { %p387_p0 = scmp.ne.s32.totalorder %s558_s27, %s386_s13  ;;  %s391_s16 = sshll.u32 %s469_s14, 4  ;;  %s392_s16 = int_to_ptr.vmem [resolvable:$false] %s391_s16 }
  0x22   : > { %s393_s20 = scalar_lea.vmem %s392_s16, 512  ;;  %p394_p11 = scmp.lt.s32.totalorder %s558_s27, %s392_s16 }
  0x23   : > { %p389_p2 = pnand %p387_p0, %p373_p1  ;;  %p395_p4 = scmp.lt.s32.totalorder %s393_s20, %s386_s13 }
  0x25   : > { %p390_p12 = pneg %p389_p2  ;;  %p396_p5 = por %p395_p4, %p394_p11 }
  0x27   : > { %p397_p7 = pnand %p396_p5, %p390_p12 }
  0x29   : > { %400 = shalt.err (!%p397_p7)
}
  0x2a   : > { %s470_s21 = smov 128   ;;  %s471_s22 = smov 8  }
  0x2b   : > { %326 = dma.hbm_to_vmem [thread:$0]  (!%p554_p13), %s550_s25, 256, %s558_s27, %s560_s29, %s470_s21, %s470_s21, %s471_s22  }
  0x2c   : > { %p309_p9 = scmp.ge.s32.totalorder %s467_s9, 1  ;;  %p106_p1 = scmp.lt.s32.totalorder %s467_s9, 3 }
  0x2e   : > { %p107_p3 = pnand %p309_p9, %p106_p1 }
  0x2f   : > { %s591_s23 = sand.u32 (!%p107_p3), 1, %s459_s7  }
  0x30   : > { %110 = sbr.rel (%p107_p3) target bundleno = 213 (0xd5), region = 24  ;;  %s310_s24 = sshll.u32 (!%p107_p3), %s591_s23, 4 }
  0x31   : > { %s113_s26 = scalar_lea.sflag (!%p107_p3), [#allocation3], %s591_s23  ;;  %s116_s30 = scalar_lea.vmem (!%p107_p3), [#allocation2], %s310_s24 }
  0x37   : > { %446 = dma.done.wait (%p530_p6), %s113_s26, 256  }
  0x38   : > { %448 = vsyncadd (%p530_p6), %s113_s26, 4294967040  ;;  %v135_v0 = vld [vmem:[%s116_s30] sm:$0xff]  ;;  %v136_v1 = vld [vmem:[%s116_s30 + $0x8] sm:$0xff]  ;;  %vm139_vm0 = vcmask 1040384   ;;  %vm146_vm1 = vcmask 1046528   ;;  %s472_s25 = smov 1  }
  0x39   : > { %v140_v2 = vrot.slane %v135_v0, 7  ;;  %v147_v3 = vrot.slane %v135_v0, 1  ;;  %v148_v4 = vrot.slane %v136_v1, 1  ;;  %v153_v5 = vmul.f32 2.0, %v135_v0  ;;  %s473_s17 = smov 127   ;;  %s318_s27 = sshll.u32 %s508_s10, 8 }
  0x3a   : > { %v141_v6 = vrot.slane %v136_v1, 7  ;;  %v154_v7 = vmul.f32 2.0, %v136_v1  ;;  %vm169_vm2 = vcmask 7168   ;;  %vm188_vm3 = vcmask 121856   ;;  %s134_s28 = scalar_lea.vmem [#allocation5], %s310_s24  ;;  %s611_s4 = scalar_lea.hbm %s658_s1, %s318_s27 }
  0x3b   : > { %v145_v8 = vsel %vm139_vm0, 0.0, %v140_v2  ;;  %v149_v9 = vsel %vm146_vm1, %v147_v3, %v148_v4  ;;  %v152_v10 = vsel %vm146_vm1, %v148_v4, 0.0  ;;  %s230_s29 = sshll.u32 %s134_s28, 4  ;;  %vm213_vm4 = vcmask 130048   ;;  %s217_s10 = scalar_lea.sflag [#allocation4], %s591_s23  ;;  %s613_s29 = int_to_ptr.vmem [resolvable:$true] %s230_s29 }
  0x3c   : > { %v159_v11 = vsub.f32 %v145_v8, %v149_v9  ;;  %v155_v12 = vadd.f32 %v153_v5, %v145_v8  ;;  %v142_v13 = vsel %vm139_vm0, %v140_v2, %v141_v6  ;;  %s401_s5 = scalar_lea.vmem %s613_s29, 256  ;;  %p665_p11 = scmp.ne.s32.totalorder %s662_s18, 0 }
  0x3d   : > { %v156_v14 = vadd.f32 %v154_v7, %v142_v13  ;;  %v160_v16 = vsub.f32 %v142_v13, %v152_v10  ;;  %p402_p6 = scmp.ne.s32.totalorder %s613_s29, %s401_s5  ;;  %s474_s11 = smov [#allocation5]  }
  0x3e   : > { %174 = vrot.lane.b32.xlu0 %v159_v11, %s472_s25  ;;  %v157_v15 = vadd.f32 %v155_v12, %v149_v9  ;;  %v201_v22 = vmul.f32 2.0, %v159_v11  ;;  %s405_s13 = sshll.u32 %s474_s11, 4  ;;  %s406_s13 = int_to_ptr.vmem [resolvable:$false] %s405_s13 }
  0x3f   : > { %v158_v17 = vadd.f32 %v156_v14, %v152_v10  ;;  %v202_v26 = vmul.f32 2.0, %v160_v16  ;;  %p403_p12 = pnand %p402_p6, %p665_p11  ;;  %s407_s14 = scalar_lea.vmem %s406_s13, 512 }
  0x40   : > { %163 = vrot.lane.b32.xlu1 %v157_v15, %s472_s25  ;;  %p408_p8 = scmp.lt.s32.totalorder %s613_s29, %s406_s13  ;;  %p409_p10 = scmp.lt.s32.totalorder %s407_s14, %s401_s5 }
  0x41   : > { %p404_p13 = pneg %p403_p12 }
  0x42   : > { %176 = vrot.lane.b32.xlu0 %v160_v16, %s472_s25  ;;  %p410_p0 = por %p409_p10, %p408_p8 }
  0x44   : > { %165 = vrot.lane.b32.xlu1 %v158_v17, %s472_s25  ;;  %p411_p2 = pnand %p410_p0, %p404_p13 }
  0x46   : > { %182 = vrot.lane.b32.xlu0 %v157_v15, %s473_s17 }
  0x48   : > { %184 = vrot.lane.b32.xlu1 %v158_v17, %s473_s17 }
  0x4a   : > { %191 = vrot.lane.b32.xlu0 %v159_v11, %s473_s17 }
  0x4c   : > { %193 = vrot.lane.b32.xlu1 %v160_v16, %s473_s17 }
  0xb0   : > { %v175_v18 = vpop.permute.xlu0 %174 }
  0xb1   : > { %v180_v24 = vsel %vm169_vm2, 0.0, %v175_v18 }
  0xb2   : > { %v164_v19 = vpop.permute.xlu1 %163  ;;  %v203_v31 = vadd.f32 %v201_v22, %v180_v24 }
  0xb3   : > { %v170_v28 = vsel %vm169_vm2, 0.0, %v164_v19 }
  0xb4   : > { %v177_v20 = vpop.permute.xlu0 %176 }
  0xb5   : > { %v181_v29 = vsel %vm169_vm2, 0.0, %v177_v20 }
  0xb6   : > { %v166_v21 = vpop.permute.xlu1 %165  ;;  %v204_v36 = vadd.f32 %v202_v26, %v181_v29 }
  0xb7   : > { %v171_v34 = vsel %vm169_vm2, 0.0, %v166_v21 }
  0xb8   : > { %v183_v23 = vpop.permute.xlu0 %182 }
  0xb9   : > { %v189_v25 = vsel %vm188_vm3, %v183_v23, 0.0 }
  0xba   : > { %v185_v27 = vpop.permute.xlu1 %184  ;;  %v199_v32 = vsub.f32 %v189_v25, %v170_v28 }
  0xbb   : > { %v190_v30 = vsel %vm188_vm3, %v185_v27, 0.0 }
  0xbc   : > { %v192_v33 = vpop.permute.xlu0 %191  ;;  %v200_v37 = vsub.f32 %v190_v30, %v171_v34  ;;  %v207_v41 = vand.u32 2147483647, %v199_v32 }
  0xbd   : > { %v197_v35 = vsel %vm188_vm3, %v192_v33, 0.0 }
  0xbe   : > { %v205_v38 = vadd.f32 %v203_v31, %v197_v35  ;;  %v194_v39 = vpop.permute.xlu1 %193  ;;  %v208_v44 = vand.u32 2147483647, %v200_v37 }
  0xbf   : > { %v198_v40 = vsel %vm188_vm3, %v194_v39, 0.0 }
  0xc0   : > { %v209_v42 = vand.u32 2147483647, %v205_v38  ;;  %v206_v43 = vadd.f32 %v204_v36, %v198_v40 }
  0xc2   : > { %v211_v45 = vadd.f32 %v209_v42, %v207_v41  ;;  %v210_v46 = vand.u32 2147483647, %v206_v43 }
  0xc4   : > { %214 = vst.msk [vmem:[%s134_s28] sm:$0xff] %vm213_vm4, %v211_v45  ;;  %v212_v47 = vadd.f32 %v210_v46, %v208_v44 }
  0xc6   : > { %215 = vst.msk [vmem:[%s134_s28 + $0x8] sm:$0xff] %vm213_vm4, %v212_v47 }
  0xc7   : > { %414 = shalt.err (!%p411_p2)
}
  0xc8   : > { %s415_s16 = scalar_lea.hbm %s611_s4, 256  ;;  %s419_s22 = scalar_lea.hbm %s658_s1, 512 }
  0xc9   : > { %p416_p4 = scmp.ne.s32.totalorder %s611_s4, %s415_s16  ;;  %p420_p9 = scmp.lt.u32.totalorder %s611_s4, %s658_s1 }
  0xca   : > { %p421_p1 = scmp.lt.u32.totalorder %s419_s22, %s415_s16  ;;  %p423_p6 = scmp.lt.u32.totalorder %s415_s16, %s611_s4 }
  0xcb   : > { %p417_p5 = pnand %p416_p4, %p665_p11 }
  0xcc   : > { %p422_p3 = por %p421_p1, %p420_p9 }
  0xcd   : > { %p418_p7 = pneg %p417_p5 }
  0xce   : > { %p424_p12 = por %p423_p6, %p422_p3 }
  0xd0   : > { %p425_p13 = pnand %p424_p12, %p418_p7 }
  0xd2   : > { %428 = shalt.err (!%p425_p13)
}
  0xd3   : > { %s475_s30 = smov 128   ;;  %s476_s25 = smov 8  }
  0xd4   : > { %321 = dma.vmem_to_hbm [thread:$0]  (%p665_p11), %s613_s29, 256, %s611_s4, %s217_s10, %s475_s30, %s475_s30, %s476_s25  }
  0xd5 PF: > { %s245_s17 = sand.u32 1, %s455_s6   ;;  %p666_p8 = scmp.ne.s32.totalorder %s663_s19, 0 }
  0xd6   : > { %p667_p10 = scmp.ge.s32.totalorder %s467_s9, 2  ;;  %s246_s27 = scalar_lea.sflag [#allocation4], %s245_s17 }
  0xd8   : > { %p328_p0 = pnand %p667_p10, %p666_p8 }
  0xda   : > { %450 = dma.done.wait (!%p328_p0), %s246_s27, 256  }
  0xdb   : > { %452 = vsyncadd (!%p328_p0), %s246_s27, 4294967040  ;;  %p14_p2 = scmp.ge.s32.totalorder %s512_s12, 4   ;;  %s668_s6 = smov %s459_s7 }
  0xdc   : > { %s669_s7 = smov %s463_s8  ;;  %s670_s8 = smov %s524_s15 }
  0xdd   : > { %s671_s9 = smov %s512_s12  ;;  %16 = sbr.rel (!%p14_p2) target bundleno = 5 (0x5), region = 69 }
  0xe4   :  { %251 = vsyncpa [#allocation3], 1 }
  0xe5   :  { %253 = vsyncpa [#allocation3 + $0x1], 1 }
  0xe6   :  { %254 = vsyncpa [#allocation4], 1 }
  0xe7   :  { %256 = vsyncpa [#allocation4 + $0x1], 1 }

</bundles_post_ra>
